<compile_context>
chip_gen: v7x
topology: tpu7x:2x2x1
jax: 0.10.0
libtpu: 0.0.40
codegen_flags: <defaults>
</compile_context>

<pallas_src>
import jax
import jax.numpy as jnp
from jax.experimental import pallas as pl
from jax.experimental.pallas import tpu as pltpu

INSHAPE = (7, 7)
INSIZE = INSHAPE[0] * INSHAPE[1]     # 49
HIDDEN = 100
NUM_ACTIONS = 5
NUM_REPS = 5

# Padded (lane-dense) sizes.
INSIZE_P = 64                        # 49 -> 64
HIDDEN_P = 128                       # 100 -> 128 (one full vreg lane width)
GATES_P = 4 * HIDDEN_P               # 512, gates stacked on the lane axis
HEADS_P = 128                        # 5 + 5 -> 128

TB_DEFAULT = 8                       # time steps per grid iteration (multiple of 8)


def pack_params(weight_ih, weight_hh, bias_ih, bias_hh, wa, ba, wr, br):
    """Repack PyTorch-layout parameters into the fused, zero-padded kernel layout.

    Weights are cast to bf16 (MXU operands); biases stay f32.
    """
    wih_g = weight_ih.reshape(4, HIDDEN, INSIZE).transpose(0, 2, 1)   # (4, 49, 100)
    whh_g = weight_hh.reshape(4, HIDDEN, HIDDEN).transpose(0, 2, 1)   # (4, 100, 100)
    b_g = (bias_ih + bias_hh).reshape(4, HIDDEN)                      # (4, 100)

    w_ih = jnp.zeros((INSIZE_P, GATES_P), jnp.float32)
    w_hh = jnp.zeros((HIDDEN_P, GATES_P), jnp.float32)
    b = jnp.zeros((1, GATES_P), jnp.float32)
    for g in range(4):
        lo = g * HIDDEN_P
        w_ih = w_ih.at[:INSIZE, lo:lo + HIDDEN].set(wih_g[g])
        w_hh = w_hh.at[:HIDDEN, lo:lo + HIDDEN].set(whh_g[g])
        b = b.at[0, lo:lo + HIDDEN].set(b_g[g])

    w_head = jnp.zeros((HIDDEN_P, HEADS_P), jnp.float32)
    b_head = jnp.zeros((1, HEADS_P), jnp.float32)
    w_head = w_head.at[:HIDDEN, 0:NUM_ACTIONS].set(wa.T)
    w_head = w_head.at[:HIDDEN, NUM_ACTIONS:NUM_ACTIONS + NUM_REPS].set(wr.T)
    b_head = b_head.at[0, 0:NUM_ACTIONS].set(ba)
    b_head = b_head.at[0, NUM_ACTIONS:NUM_ACTIONS + NUM_REPS].set(br)

    return (w_ih.astype(jnp.bfloat16), w_hh.astype(jnp.bfloat16), b,
            w_head.astype(jnp.bfloat16), b_head)


def make_params(key):
    """Deterministic init mirroring the PyTorch module's parameter shapes."""
    k = 1.0 / jnp.sqrt(jnp.float32(HIDDEN))
    keys = jax.random.split(key, 8)
    weight_ih = jax.random.uniform(keys[0], (4 * HIDDEN, INSIZE), jnp.float32, -k, k)
    weight_hh = jax.random.uniform(keys[1], (4 * HIDDEN, HIDDEN), jnp.float32, -k, k)
    bias_ih = jax.random.uniform(keys[2], (4 * HIDDEN,), jnp.float32, -k, k)
    bias_hh = jax.random.uniform(keys[3], (4 * HIDDEN,), jnp.float32, -k, k)
    wa = jax.random.uniform(keys[4], (NUM_ACTIONS, HIDDEN), jnp.float32, -k, k)
    ba = jax.random.uniform(keys[5], (NUM_ACTIONS,), jnp.float32, -k, k)
    wr = jax.random.uniform(keys[6], (NUM_REPS, HIDDEN), jnp.float32, -k, k)
    br = jax.random.uniform(keys[7], (NUM_REPS,), jnp.float32, -k, k)
    raw = (weight_ih, weight_hh, bias_ih, bias_hh, wa, ba, wr, br)
    return pack_params(*raw), raw


def init_hidden_state():
    """Padded (1, HIDDEN_P) zero state — padded lanes stay 0 across steps."""
    return (jnp.zeros((1, HIDDEN_P), jnp.float32),
            jnp.zeros((1, HIDDEN_P), jnp.float32))


def agent_rollout(x_seq, hidden_state, params, tb=TB_DEFAULT):
    """Run T agent steps in ONE pallas_call (weights VMEM-resident across steps).

    x_seq: (T, 7, 7); hidden_state: (h, c) each (1, HIDDEN_P) padded.
    Returns ((actions (T,5), reps (T,5)), (h_new, c_new)).
    """
    h0, c0 = hidden_state
    T = int(x_seq.shape[0])
    assert tb % 8 == 0
    if T < tb:                       # single block == full array (no (8,128) issue)
        tb = T
    T_pad = ((T + tb - 1) // tb) * tb
    needs_mask = (T_pad != T)
    grid_t = T_pad // tb

    x_flat = x_seq.reshape(T, INSIZE).astype(jnp.float32)
    x_pad = jnp.zeros((T_pad, INSIZE_P), jnp.float32).at[:T, :INSIZE].set(x_flat)
    x_pad = x_pad.astype(jnp.bfloat16)          # bf16 MXU operand

    w_ih, w_hh, b, w_head, b_head = params

    def kernel(x_ref, h0_ref, c0_ref,
               w_ih_ref, w_hh_ref, b_ref, w_head_ref, b_head_ref,
               heads_ref, h_out_ref, c_out_ref,
               h_hist):
        t_blk = pl.program_id(0)

        # h_out/c_out have constant index maps -> grid-resident; they ARE the
        # recurrent carry (initialized from h0/c0 on the first block only).
        @pl.when(t_blk == 0)
        def _():
            h_out_ref[...] = h0_ref[...]
            c_out_ref[...] = c0_ref[...]

        w_hh_v = w_hh_ref[...]                   # (128, 512) bf16, VMEM-resident

        # Batched input projection for the whole block (off the serial chain):
        # (tb, 64) @ (64, 512) + bias -> (tb, 512) f32.
        gx = (jnp.dot(x_ref[...], w_ih_ref[...],
                      preferred_element_type=jnp.float32)
              + b_ref[...])

        h = h_out_ref[...]                       # (1, 128) f32 carried state
        c = c_out_ref[...]

        # Serial recurrence over the tb steps of this block (statically unrolled).
        for i in range(tb):
            gates = gx[i:i + 1, :] + jnp.dot(h.astype(jnp.bfloat16), w_hh_v,
                                             preferred_element_type=jnp.float32)
            # PyTorch LSTMCell gate order: i, f, g, o — 128-lane aligned slices.
            i_g = jax.nn.sigmoid(gates[:, 0 * HIDDEN_P:1 * HIDDEN_P])
            f_g = jax.nn.sigmoid(gates[:, 1 * HIDDEN_P:2 * HIDDEN_P])
            g_g = jnp.tanh(gates[:, 2 * HIDDEN_P:3 * HIDDEN_P])
            o_g = jax.nn.sigmoid(gates[:, 3 * HIDDEN_P:4 * HIDDEN_P])
            c_new = f_g * c + i_g * g_g          # padded lanes stay exactly 0
            h_new = o_g * jnp.tanh(c_new)
            if needs_mask:
                # Padded steps (global step >= T) leave the state unchanged.
                keep = ((t_blk * tb + i) < T).astype(jnp.float32)
                h = keep * h_new + (1.0 - keep) * h
                c = keep * c_new + (1.0 - keep) * c
            else:
                h, c = h_new, c_new
            h_hist[i:i + 1, :] = h               # static-index scratch store

        h_out_ref[...] = h                       # 2 stores per block (not per step)
        c_out_ref[...] = c

        # Heads off the critical path: one fused (tb,128)@(128,128) matmul,
        # then a batched single-exp dual softmax and ONE dense (tb,128) store.
        logits = (jnp.dot(h_hist[...].astype(jnp.bfloat16), w_head_ref[...],
                          preferred_element_type=jnp.float32)
                  + b_head_ref[...])             # (tb, 128) f32

        lane = jax.lax.broadcasted_iota(jnp.int32, logits.shape, 1)
        mask_a = lane < NUM_ACTIONS
        mask_r = jnp.logical_and(lane >= NUM_ACTIONS,
                                 lane < NUM_ACTIONS + NUM_REPS)
        mask_v = lane < NUM_ACTIONS + NUM_REPS
        neg = jnp.float32(-1e30)

        max_a = jnp.max(jnp.where(mask_a, logits, neg), axis=-1, keepdims=True)
        max_r = jnp.max(jnp.where(mask_r, logits, neg), axis=-1, keepdims=True)
        gmax = jnp.where(mask_a, max_a, max_r)   # group max per lane group
        e = jnp.exp(jnp.where(mask_v, logits - gmax, neg))   # single exp; pad lanes -> 0
        sum_a = jnp.sum(jnp.where(mask_a, e, 0.0), axis=-1, keepdims=True)
        sum_r = jnp.sum(jnp.where(mask_r, e, 0.0), axis=-1, keepdims=True)
        inv = jnp.where(mask_a,
                        pl.reciprocal(sum_a, approx=True),
                        pl.reciprocal(sum_r, approx=True))
        heads_ref[...] = e * inv                 # actions lanes 0:5, reps 5:10

    heads, h_new, c_new = pl.pallas_call(
        kernel,
        out_shape=(
            jax.ShapeDtypeStruct((T_pad, HEADS_P), jnp.float32),
            jax.ShapeDtypeStruct((1, HIDDEN_P), jnp.float32),
            jax.ShapeDtypeStruct((1, HIDDEN_P), jnp.float32),
        ),
        grid_spec=pltpu.PrefetchScalarGridSpec(
            num_scalar_prefetch=0,
            grid=(grid_t,),
            in_specs=[
                pl.BlockSpec((tb, INSIZE_P), lambda t: (t, 0)),       # x block (per TB steps)
                pl.BlockSpec((1, HIDDEN_P), lambda t: (0, 0)),        # h0
                pl.BlockSpec((1, HIDDEN_P), lambda t: (0, 0)),        # c0
                pl.BlockSpec((INSIZE_P, GATES_P), lambda t: (0, 0)),  # W_ih (resident)
                pl.BlockSpec((HIDDEN_P, GATES_P), lambda t: (0, 0)),  # W_hh (resident)
                pl.BlockSpec((1, GATES_P), lambda t: (0, 0)),         # bias (resident)
                pl.BlockSpec((HIDDEN_P, HEADS_P), lambda t: (0, 0)),  # W_heads (resident)
                pl.BlockSpec((1, HEADS_P), lambda t: (0, 0)),         # b_heads (resident)
            ],
            out_specs=(
                pl.BlockSpec((tb, HEADS_P), lambda t: (t, 0)),        # per-block heads
                pl.BlockSpec((1, HIDDEN_P), lambda t: (0, 0)),        # final h (carry)
                pl.BlockSpec((1, HIDDEN_P), lambda t: (0, 0)),        # final c (carry)
            ),
            scratch_shapes=[pltpu.VMEM((tb, HIDDEN_P), jnp.float32)], # h history for heads
        ),
        compiler_params=pltpu.CompilerParams(
            dimension_semantics=("arbitrary",)),   # recurrent time axis (serial)
    )(x_pad, h0, c0, w_ih, w_hh, b, w_head, b_head)

    actions = heads[:T, 0:NUM_ACTIONS]
    reps = heads[:T, NUM_ACTIONS:NUM_ACTIONS + NUM_REPS]
    return (actions, reps), (h_new, c_new)


def agent_forward(x, hidden_state, params):
    """Single-step equivalent of Agent.forward: x (1, 7, 7) -> ((5,), (5,)), new state."""
    (actions, reps), new_state = agent_rollout(x, hidden_state, params)
    return (actions[0], reps[0]), new_state   # .flatten() in the torch module


def reference_rollout(x_seq, h, c, raw):
    """Pure-JAX f32 reference (exactly the PyTorch LSTMCell + Linear + softmax math)."""
    weight_ih, weight_hh, bias_ih, bias_hh, wa, ba, wr, br = raw
    acts, rps = [], []
    for t in range(x_seq.shape[0]):
        xt = x_seq[t].reshape(1, -1)
        gates = xt @ weight_ih.T + h @ weight_hh.T + bias_ih + bias_hh
        i, f, g, o = jnp.split(gates, 4, axis=-1)
        i = jax.nn.sigmoid(i)
        f = jax.nn.sigmoid(f)
        g = jnp.tanh(g)
        o = jax.nn.sigmoid(o)
        c = f * c + i * g
        h = o * jnp.tanh(c)
        acts.append(jax.nn.softmax(h @ wa.T + ba, axis=-1)[0])
        rps.append(jax.nn.softmax(h @ wr.T + br, axis=-1)[0])
    return jnp.stack(acts), jnp.stack(rps), h, c


# TODO(synk): mutate/save/load/reset/paramcount are host-side stateful utilities,
# not part of the forward pass, and are not implemented as kernels.
# TODO(synk): on v7x, multiple independent agents could be batched on a leading
# "parallel" grid axis to use both TensorCores; a single rollout is inherently serial.

if __name__ == "__main__":
    key = jax.random.PRNGKey(0)
    key_params, key_x1, key_x2, key_x3 = jax.random.split(key, 4)

    packed, raw = make_params(key_params)

    # --- single step (matches Agent.forward semantics, batch = 1) ---
    x1 = jax.random.normal(key_x1, (1,) + INSHAPE, dtype=jnp.float32)
    state = init_hidden_state()
    (actions, reps), state = agent_forward(x1, state, packed)
    jax.block_until_ready((actions, reps, state))

    assert actions.shape == (NUM_ACTIONS,)
    assert reps.shape == (NUM_REPS,)
    assert abs(float(jnp.sum(actions)) - 1.0) < 1e-2
    assert abs(float(jnp.sum(reps)) - 1.0) < 1e-2

    # --- multi-step rollout (T divisible by TB) vs pure-JAX f32 reference ---
    T = 8
    x_seq = jax.random.normal(key_x2, (T,) + INSHAPE, dtype=jnp.float32)
    (acts_k, reps_k), (h_k, c_k) = agent_rollout(x_seq, init_hidden_state(), packed)
    jax.block_until_ready((acts_k, reps_k, h_k, c_k))

    acts_r, reps_r, h_r, c_r = reference_rollout(
        x_seq, jnp.zeros((1, HIDDEN), jnp.float32), jnp.zeros((1, HIDDEN), jnp.float32), raw)

    assert jnp.allclose(acts_k, acts_r, atol=2e-2), "actions mismatch vs reference"
    assert jnp.allclose(reps_k, reps_r, atol=2e-2), "reps mismatch vs reference"
    assert jnp.allclose(h_k[:, :HIDDEN], h_r, atol=2e-2), "hidden state mismatch"
    assert jnp.allclose(c_k[:, :HIDDEN], c_r, atol=2e-2), "cell state mismatch"
    # Padded lanes of the carried state must stay (numerically) zero.
    assert float(jnp.max(jnp.abs(h_k[:, HIDDEN:]))) < 1e-6
    assert float(jnp.max(jnp.abs(c_k[:, HIDDEN:]))) < 1e-6

    # --- ragged rollout (T not divisible by TB) exercises the padded-step mask ---
    T2 = 11
    x_seq2 = jax.random.normal(key_x3, (T2,) + INSHAPE, dtype=jnp.float32)
    (acts_k2, reps_k2), (h_k2, c_k2) = agent_rollout(x_seq2, init_hidden_state(), packed)
    jax.block_until_ready((acts_k2, reps_k2, h_k2, c_k2))

    acts_r2, reps_r2, h_r2, c_r2 = reference_rollout(
        x_seq2, jnp.zeros((1, HIDDEN), jnp.float32), jnp.zeros((1, HIDDEN), jnp.float32), raw)

    assert acts_k2.shape == (T2, NUM_ACTIONS) and reps_k2.shape == (T2, NUM_REPS)
    assert jnp.allclose(acts_k2, acts_r2, atol=2e-2), "ragged actions mismatch"
    assert jnp.allclose(reps_k2, reps_r2, atol=2e-2), "ragged reps mismatch"
    assert jnp.allclose(h_k2[:, :HIDDEN], h_r2, atol=2e-2), "ragged hidden state mismatch"
    assert jnp.allclose(c_k2[:, :HIDDEN], c_r2, atol=2e-2), "ragged cell state mismatch"

    print("KERNEL_OK")
</pallas_src>

<mosaic_0001>
module attributes {stable_mosaic.version = 11 : i64} {
  func.func @kernel(%arg0: i32, %arg1: memref<1x64xbf16, #tpu.memory_space<vmem>>, %arg2: memref<1x128xf32, #tpu.memory_space<vmem>>, %arg3: memref<1x128xf32, #tpu.memory_space<vmem>>, %arg4: memref<64x512xbf16, #tpu.memory_space<vmem>>, %arg5: memref<128x512xbf16, #tpu.memory_space<vmem>>, %arg6: memref<1x512xf32, #tpu.memory_space<vmem>>, %arg7: memref<128x128xbf16, #tpu.memory_space<vmem>>, %arg8: memref<1x128xf32, #tpu.memory_space<vmem>>, %arg9: memref<1x128xf32, #tpu.memory_space<vmem>>, %arg10: memref<1x128xf32, #tpu.memory_space<vmem>>, %arg11: memref<1x128xf32, #tpu.memory_space<vmem>>, %arg12: memref<1x128xf32, #tpu.memory_space<vmem>>) attributes {dimension_semantics = [#tpu.dimension_semantics<arbitrary>], iteration_bounds = array<i64: 1>, scalar_prefetch = 0 : i64, scratch_operands = 1 : i64, tpu.core_type = #tpu.core_type<tc>, window_params = [{transform_indices = @transform_0, window_bounds = array<i64: 1, 64>}, {pipeline_mode = #tpu.pipeline_mode<synchronous>, transform_indices = @transform_1, window_bounds = array<i64: 1, 128>}, {pipeline_mode = #tpu.pipeline_mode<synchronous>, transform_indices = @transform_2, window_bounds = array<i64: 1, 128>}, {pipeline_mode = #tpu.pipeline_mode<synchronous>, transform_indices = @transform_3, window_bounds = array<i64: 64, 512>}, {pipeline_mode = #tpu.pipeline_mode<synchronous>, transform_indices = @transform_4, window_bounds = array<i64: 128, 512>}, {pipeline_mode = #tpu.pipeline_mode<synchronous>, transform_indices = @transform_5, window_bounds = array<i64: 1, 512>}, {pipeline_mode = #tpu.pipeline_mode<synchronous>, transform_indices = @transform_6, window_bounds = array<i64: 128, 128>}, {pipeline_mode = #tpu.pipeline_mode<synchronous>, transform_indices = @transform_7, window_bounds = array<i64: 1, 128>}, {transform_indices = @transform_8, window_bounds = array<i64: 1, 128>}, {pipeline_mode = #tpu.pipeline_mode<synchronous>, transform_indices = @transform_9, window_bounds = array<i64: 1, 128>}, {pipeline_mode = #tpu.pipeline_mode<synchronous>, transform_indices = @transform_10, window_bounds = array<i64: 1, 128>}]} {
    %c0_i32 = arith.constant 0 : i32
    %0 = arith.cmpi eq, %arg0, %c0_i32 : i32
    %1 = arith.extui %0 : i1 to i32
    %c0_i32_0 = arith.constant 0 : i32
    %2 = arith.cmpi ne, %1, %c0_i32_0 : i32
    scf.if %2 {
      %c0_42 = arith.constant 0 : index
      %c0_43 = arith.constant 0 : index
      %92 = vector.load %arg2[%c0_42, %c0_43] : memref<1x128xf32, #tpu.memory_space<vmem>>, vector<1x128xf32>
      %c0_44 = arith.constant 0 : index
      %c0_45 = arith.constant 0 : index
      %93 = vector.load %arg10[%c0_44, %c0_45] : memref<1x128xf32, #tpu.memory_space<vmem>>, vector<1x128xf32>
      tpu.vector_store %arg10[%c0_44, %c0_45], %92 {strides = array<i32>} : memref<1x128xf32, #tpu.memory_space<vmem>>, vector<1x128xf32>,
      %c0_46 = arith.constant 0 : index
      %c0_47 = arith.constant 0 : index
      %94 = vector.load %arg3[%c0_46, %c0_47] : memref<1x128xf32, #tpu.memory_space<vmem>>, vector<1x128xf32>
      %c0_48 = arith.constant 0 : index
      %c0_49 = arith.constant 0 : index
      %95 = vector.load %arg11[%c0_48, %c0_49] : memref<1x128xf32, #tpu.memory_space<vmem>>, vector<1x128xf32>
      tpu.vector_store %arg11[%c0_48, %c0_49], %94 {strides = array<i32>} : memref<1x128xf32, #tpu.memory_space<vmem>>, vector<1x128xf32>,
    } else {
    }
    %c0 = arith.constant 0 : index
    %c0_1 = arith.constant 0 : index
    %3 = vector.load %arg5[%c0, %c0_1] : memref<128x512xbf16, #tpu.memory_space<vmem>>, vector<128x512xbf16>
    %c0_2 = arith.constant 0 : index
    %c0_3 = arith.constant 0 : index
    %4 = vector.load %arg1[%c0_2, %c0_3] : memref<1x64xbf16, #tpu.memory_space<vmem>>, vector<1x64xbf16>
    %c0_4 = arith.constant 0 : index
    %c0_5 = arith.constant 0 : index
    %5 = vector.load %arg4[%c0_4, %c0_5] : memref<64x512xbf16, #tpu.memory_space<vmem>>, vector<64x512xbf16>
    %cst = arith.constant dense<0.000000e+00> : vector<1x512xf32>
    %6 = tpu.matmul %4, %5, %cst {dimension_numbers = #tpu.dot_dimension_numbers<[1], [0], [0], [1], [0, 0, 1, 1], [], []>} : vector<1x64xbf16>, vector<64x512xbf16>, vector<1x512xf32> -> vector<1x512xf32>
    %c0_6 = arith.constant 0 : index
    %c0_7 = arith.constant 0 : index
    %7 = vector.load %arg6[%c0_6, %c0_7] : memref<1x512xf32, #tpu.memory_space<vmem>>, vector<1x512xf32>
    %8 = arith.addf %6, %7 : vector<1x512xf32>
    %c0_8 = arith.constant 0 : index
    %c0_9 = arith.constant 0 : index
    %9 = vector.load %arg10[%c0_8, %c0_9] : memref<1x128xf32, #tpu.memory_space<vmem>>, vector<1x128xf32>
    %c0_10 = arith.constant 0 : index
    %c0_11 = arith.constant 0 : index
    %10 = vector.load %arg11[%c0_10, %c0_11] : memref<1x128xf32, #tpu.memory_space<vmem>>, vector<1x128xf32>
    %11 = arith.truncf %9 : vector<1x128xf32> to vector<1x128xbf16>
    %cst_12 = arith.constant dense<0.000000e+00> : vector<1x512xf32>
    %12 = tpu.matmul %11, %3, %cst_12 {dimension_numbers = #tpu.dot_dimension_numbers<[1], [0], [0], [1], [0, 0, 1, 1], [], []>} : vector<1x128xbf16>, vector<128x512xbf16>, vector<1x512xf32> -> vector<1x512xf32>
    %13 = arith.addf %8, %12 : vector<1x512xf32>
    %14 = vector.extract_strided_slice %13 {offsets = [0, 0], sizes = [1, 128], strides = [1, 1]} : vector<1x512xf32> to vector<1x128xf32>
    %15 = arith.negf %14 : vector<1x128xf32>
    %16 = math.exp %15 : vector<1x128xf32>
    %cst_13 = arith.constant 1.000000e+00 : f32
    %17 = vector.broadcast %cst_13 : f32 to vector<1x128xf32>
    %18 = arith.addf %17, %16 : vector<1x128xf32>
    %19 = arith.divf %17, %18 : vector<1x128xf32>
    %20 = vector.extract_strided_slice %13 {offsets = [0, 128], sizes = [1, 128], strides = [1, 1]} : vector<1x512xf32> to vector<1x128xf32>
    %21 = arith.negf %20 : vector<1x128xf32>
    %22 = math.exp %21 : vector<1x128xf32>
    %cst_14 = arith.constant 1.000000e+00 : f32
    %23 = vector.broadcast %cst_14 : f32 to vector<1x128xf32>
    %24 = arith.addf %23, %22 : vector<1x128xf32>
    %25 = arith.divf %23, %24 : vector<1x128xf32>
    %26 = vector.extract_strided_slice %13 {offsets = [0, 256], sizes = [1, 128], strides = [1, 1]} : vector<1x512xf32> to vector<1x128xf32>
    %27 = math.tanh %26 : vector<1x128xf32>
    %28 = vector.extract_strided_slice %13 {offsets = [0, 384], sizes = [1, 128], strides = [1, 1]} : vector<1x512xf32> to vector<1x128xf32>
    %29 = arith.negf %28 : vector<1x128xf32>
    %30 = math.exp %29 : vector<1x128xf32>
    %cst_15 = arith.constant 1.000000e+00 : f32
    %31 = vector.broadcast %cst_15 : f32 to vector<1x128xf32>
    %32 = arith.addf %31, %30 : vector<1x128xf32>
    %33 = arith.divf %31, %32 : vector<1x128xf32>
    %34 = arith.mulf %25, %10 : vector<1x128xf32>
    %35 = arith.mulf %19, %27 : vector<1x128xf32>
    %36 = arith.addf %34, %35 : vector<1x128xf32>
    %37 = math.tanh %36 : vector<1x128xf32>
    %38 = arith.mulf %33, %37 : vector<1x128xf32>
    %c0_16 = arith.constant 0 : index
    %c0_17 = arith.constant 0 : index
    %39 = vector.load %arg12[%c0_16, %c0_17] : memref<1x128xf32, #tpu.memory_space<vmem>>, vector<1x128xf32>
    tpu.vector_store %arg12[%c0_16, %c0_17], %38 {strides = array<i32>} : memref<1x128xf32, #tpu.memory_space<vmem>>, vector<1x128xf32>,
    %c0_18 = arith.constant 0 : index
    %c0_19 = arith.constant 0 : index
    %40 = vector.load %arg10[%c0_18, %c0_19] : memref<1x128xf32, #tpu.memory_space<vmem>>, vector<1x128xf32>
    tpu.vector_store %arg10[%c0_18, %c0_19], %38 {strides = array<i32>} : memref<1x128xf32, #tpu.memory_space<vmem>>, vector<1x128xf32>,
    %c0_20 = arith.constant 0 : index
    %c0_21 = arith.constant 0 : index
    %41 = vector.load %arg11[%c0_20, %c0_21] : memref<1x128xf32, #tpu.memory_space<vmem>>, vector<1x128xf32>
    tpu.vector_store %arg11[%c0_20, %c0_21], %36 {strides = array<i32>} : memref<1x128xf32, #tpu.memory_space<vmem>>, vector<1x128xf32>,
    %c0_22 = arith.constant 0 : index
    %c0_23 = arith.constant 0 : index
    %42 = vector.load %arg12[%c0_22, %c0_23] : memref<1x128xf32, #tpu.memory_space<vmem>>, vector<1x128xf32>
    %43 = arith.truncf %42 : vector<1x128xf32> to vector<1x128xbf16>
    %c0_24 = arith.constant 0 : index
    %c0_25 = arith.constant 0 : index
    %44 = vector.load %arg7[%c0_24, %c0_25] : memref<128x128xbf16, #tpu.memory_space<vmem>>, vector<128x128xbf16>
    %cst_26 = arith.constant dense<0.000000e+00> : vector<1x128xf32>
    %45 = tpu.matmul %43, %44, %cst_26 {dimension_numbers = #tpu.dot_dimension_numbers<[1], [0], [0], [1], [0, 0, 1, 1], [], []>} : vector<1x128xbf16>, vector<128x128xbf16>, vector<1x128xf32> -> vector<1x128xf32>
    %c0_27 = arith.constant 0 : index
    %c0_28 = arith.constant 0 : index
    %46 = vector.load %arg8[%c0_27, %c0_28] : memref<1x128xf32, #tpu.memory_space<vmem>>, vector<1x128xf32>
    %47 = arith.addf %45, %46 : vector<1x128xf32>
    %48 = tpu.iota {dimensions = array<i32: 1>} : vector<1x128xi32>
    %c5_i32 = arith.constant 5 : i32
    %49 = vector.broadcast %c5_i32 : i32 to vector<1x128xi32>
    %50 = arith.cmpi slt, %48, %49 : vector<1x128xi32>
    %c5_i32_29 = arith.constant 5 : i32
    %51 = vector.broadcast %c5_i32_29 : i32 to vector<1x128xi32>
    %52 = arith.cmpi sge, %48, %51 : vector<1x128xi32>
    %c10_i32 = arith.constant 10 : i32
    %53 = vector.broadcast %c10_i32 : i32 to vector<1x128xi32>
    %54 = arith.cmpi slt, %48, %53 : vector<1x128xi32>
    %55 = arith.andi %52, %54 : vector<1x128xi1>
    %c10_i32_30 = arith.constant 10 : i32
    %56 = vector.broadcast %c10_i32_30 : i32 to vector<1x128xi32>
    %57 = arith.cmpi slt, %48, %56 : vector<1x128xi32>
    %cst_31 = arith.constant -1.000000e+30 : f32
    %58 = vector.broadcast %cst_31 : f32 to vector<1x128xf32>
    %59 = arith.select %50, %47, %58 : vector<1x128xi1>, vector<1x128xf32>
    %cst_32 = arith.constant dense<0xFF800000> : vector<1xf32>
    %60 = vector.multi_reduction <maximumf>, %59, %cst_32 [1] : vector<1x128xf32> to vector<1xf32>
    %61 = vector.shape_cast %60 : vector<1xf32> to vector<1x1xf32>
    %cst_33 = arith.constant -1.000000e+30 : f32
    %62 = vector.broadcast %cst_33 : f32 to vector<1x128xf32>
    %63 = arith.select %55, %47, %62 : vector<1x128xi1>, vector<1x128xf32>
    %cst_34 = arith.constant dense<0xFF800000> : vector<1xf32>
    %64 = vector.multi_reduction <maximumf>, %63, %cst_34 [1] : vector<1x128xf32> to vector<1xf32>
    %65 = vector.shape_cast %64 : vector<1xf32> to vector<1x1xf32>
    %66 = vector.shape_cast %61 : vector<1x1xf32> to vector<1x1xf32>
    %67 = vector.broadcast %66 : vector<1x1xf32> to vector<1x128xf32>
    %68 = vector.shape_cast %65 : vector<1x1xf32> to vector<1x1xf32>
    %69 = vector.broadcast %68 : vector<1x1xf32> to vector<1x128xf32>
    %70 = arith.select %50, %67, %69 : vector<1x128xi1>, vector<1x128xf32>
    %71 = arith.subf %47, %70 : vector<1x128xf32>
    %cst_35 = arith.constant -1.000000e+30 : f32
    %72 = vector.broadcast %cst_35 : f32 to vector<1x128xf32>
    %73 = arith.select %57, %71, %72 : vector<1x128xi1>, vector<1x128xf32>
    %74 = math.exp %73 : vector<1x128xf32>
    %cst_36 = arith.constant 0.000000e+00 : f32
    %75 = vector.broadcast %cst_36 : f32 to vector<1x128xf32>
    %76 = arith.select %50, %74, %75 : vector<1x128xi1>, vector<1x128xf32>
    %cst_37 = arith.constant dense<0.000000e+00> : vector<1xf32>
    %77 = vector.multi_reduction <add>, %76, %cst_37 [1] : vector<1x128xf32> to vector<1xf32>
    %78 = vector.shape_cast %77 : vector<1xf32> to vector<1x1xf32>
    %cst_38 = arith.constant 0.000000e+00 : f32
    %79 = vector.broadcast %cst_38 : f32 to vector<1x128xf32>
    %80 = arith.select %55, %74, %79 : vector<1x128xi1>, vector<1x128xf32>
    %cst_39 = arith.constant dense<0.000000e+00> : vector<1xf32>
    %81 = vector.multi_reduction <add>, %80, %cst_39 [1] : vector<1x128xf32> to vector<1xf32>
    %82 = vector.shape_cast %81 : vector<1xf32> to vector<1x1xf32>
    %83 = tpu.reciprocal %78 {approx = true} : vector<1x1xf32> -> vector<1x1xf32>
    %84 = tpu.reciprocal %82 {approx = true} : vector<1x1xf32> -> vector<1x1xf32>
    %85 = vector.shape_cast %83 : vector<1x1xf32> to vector<1x1xf32>
    %86 = vector.broadcast %85 : vector<1x1xf32> to vector<1x128xf32>
    %87 = vector.shape_cast %84 : vector<1x1xf32> to vector<1x1xf32>
    %88 = vector.broadcast %87 : vector<1x1xf32> to vector<1x128xf32>
    %89 = arith.select %50, %86, %88 : vector<1x128xi1>, vector<1x128xf32>
    %90 = arith.mulf %74, %89 : vector<1x128xf32>
    %c0_40 = arith.constant 0 : index
    %c0_41 = arith.constant 0 : index
    %91 = vector.load %arg9[%c0_40, %c0_41] : memref<1x128xf32, #tpu.memory_space<vmem>>, vector<1x128xf32>
    tpu.vector_store %arg9[%c0_40, %c0_41], %90 {strides = array<i32>} : memref<1x128xf32, #tpu.memory_space<vmem>>, vector<1x128xf32>,
    return
  }
  func.func @transform_0(%arg0: i32) -> (i32, i32) {
    %c0_i32 = arith.constant 0 : i32
    %c0_i32_0 = arith.constant 0 : i32
    return %arg0, %c0_i32 : i32, i32
  }
  func.func @transform_1(%arg0: i32) -> (i32, i32) {
    %c0_i32 = arith.constant 0 : i32
    %c0_i32_0 = arith.constant 0 : i32
    %c0_i32_1 = arith.constant 0 : i32
    return %c0_i32, %c0_i32_0 : i32, i32
  }
  func.func @transform_2(%arg0: i32) -> (i32, i32) {
    %c0_i32 = arith.constant 0 : i32
    %c0_i32_0 = arith.constant 0 : i32
    %c0_i32_1 = arith.constant 0 : i32
    return %c0_i32, %c0_i32_0 : i32, i32
  }
  func.func @transform_3(%arg0: i32) -> (i32, i32) {
    %c0_i32 = arith.constant 0 : i32
    %c0_i32_0 = arith.constant 0 : i32
    %c0_i32_1 = arith.constant 0 : i32
    return %c0_i32, %c0_i32_0 : i32, i32
  }
  func.func @transform_4(%arg0: i32) -> (i32, i32) {
    %c0_i32 = arith.constant 0 : i32
    %c0_i32_0 = arith.constant 0 : i32
    %c0_i32_1 = arith.constant 0 : i32
    return %c0_i32, %c0_i32_0 : i32, i32
  }
  func.func @transform_5(%arg0: i32) -> (i32, i32) {
    %c0_i32 = arith.constant 0 : i32
    %c0_i32_0 = arith.constant 0 : i32
    %c0_i32_1 = arith.constant 0 : i32
    return %c0_i32, %c0_i32_0 : i32, i32
  }
  func.func @transform_6(%arg0: i32) -> (i32, i32) {
    %c0_i32 = arith.constant 0 : i32
    %c0_i32_0 = arith.constant 0 : i32
    %c0_i32_1 = arith.constant 0 : i32
    return %c0_i32, %c0_i32_0 : i32, i32
  }
  func.func @transform_7(%arg0: i32) -> (i32, i32) {
    %c0_i32 = arith.constant 0 : i32
    %c0_i32_0 = arith.constant 0 : i32
    %c0_i32_1 = arith.constant 0 : i32
    return %c0_i32, %c0_i32_0 : i32, i32
  }
  func.func @transform_8(%arg0: i32) -> (i32, i32) {
    %c0_i32 = arith.constant 0 : i32
    %c0_i32_0 = arith.constant 0 : i32
    return %arg0, %c0_i32 : i32, i32
  }
  func.func @transform_9(%arg0: i32) -> (i32, i32) {
    %c0_i32 = arith.constant 0 : i32
    %c0_i32_0 = arith.constant 0 : i32
    %c0_i32_1 = arith.constant 0 : i32
    return %c0_i32, %c0_i32_0 : i32, i32
  }
  func.func @transform_10(%arg0: i32) -> (i32, i32) {
    %c0_i32 = arith.constant 0 : i32
    %c0_i32_0 = arith.constant 0 : i32
    %c0_i32_1 = arith.constant 0 : i32
    return %c0_i32, %c0_i32_0 : i32, i32
  }
}

</mosaic_0001>

<bundles_post_ra>
// kernel: tpu_custom_call.1
= control target key start
LH: loop header
LB: loop body
LE: loop exit
PB: predicated region body
PF: predicated region fallthrough
CT: control target
= control target key end

     0   :  { %16 = vsyncpa [#allocation4], 0  ;;  %s1379_s0 = inlined_call_operand.hbm [shape: bf16[1,64], index: 0, kind: input, shape index: {}]   ;;  %s1380_s1 = inlined_call_operand.vmem [shape: f32[1,128], index: 1, kind: input, shape index: {}]   ;;  %s1381_s2 = inlined_call_operand.vmem [shape: f32[1,128], index: 2, kind: input, shape index: {}]   ;;  %s1382_s3 = inlined_call_operand.hbm [shape: bf16[64,512], index: 3, kind: input, shape index: {}]   ;;  %s1383_s4 = inlined_call_operand.hbm [shape: bf16[128,512], index: 4, kind: input, shape index: {}]   ;;  %s1384_s5 = inlined_call_operand.vmem [shape: f32[1,512], index: 5, kind: input, shape index: {}]   ;;  %s1385_s6 = inlined_call_operand.hbm [shape: bf16[128,128], index: 6, kind: input, shape index: {}]   ;;  %s1386_s7 = inlined_call_operand.vmem [shape: f32[1,128], index: 7, kind: input, shape index: {}]   ;;  %s1387_s8 = inlined_call_operand.hbm [shape: f32[1,128], index: 8, kind: output, shape index: {0}]   ;;  %s1388_s9 = inlined_call_operand.hbm [shape: f32[1,128], index: 9, kind: output, shape index: {1}]   ;;  %s1389_s10 = inlined_call_operand.hbm [shape: f32[1,128], index: 10, kind: output, shape index: {2}]  }
   0x1   :  { %17 = vsyncpa [#allocation7], 0 }
   0x2   :  { %18 = vsyncpa [#allocation10], 0 }
   0x3   :  { %19 = vsyncpa [#allocation5], 0 }
   0x4   :  { %20 = vsyncpa [#allocation13], 0  ;;  %s1173_s13 = smov [#allocation6]   ;;  %s1009_s17 = scalar_lea.hbm %s1382_s3, 2048 }
   0x5   :  { %s40_s14 = sshll.u32 %s1173_s13, 4  ;;  %p1010_p0 = scmp.ne.s32.totalorder %s1382_s3, %s1009_s17  ;;  %s41_s14 = int_to_ptr.vmem [resolvable:$true] %s40_s14 }
   0x6   :  { %p1013_p1 = scmp.lt.u32.totalorder %s1009_s17, %s1382_s3 }
   0x8   :  { %p1015_p2 = pnand %p1013_p1, %p1010_p0 }
   0xa   :  { %1018 = shalt.err (!%p1015_p2)
}
   0xb   :  { %s1019_s22 = scalar_lea.vmem %s41_s14, 2048  ;;  %p1024_p4 = scmp.lt.s32.totalorder %s41_s14, %s41_s14 }
   0xc   :  { %p1020_p3 = scmp.ne.s32.totalorder %s41_s14, %s1019_s22  ;;  %p1025_p5 = scmp.lt.s32.totalorder %s1019_s22, %s1019_s22 }
   0xe   :  { %p1026_p6 = por %p1025_p5, %p1024_p4 }
  0x10   :  { %p1027_p7 = pnand %p1026_p6, %p1020_p3 }
  0x12   :  { %1030 = shalt.err (!%p1027_p7)
}
  0x13   :  { %s1174_s23 = smov 256   ;;  %s1175_s24 = smov 16  }
  0x14   :  { %46 = dma.hbm_to_vmem [thread:$0]  %s1382_s3, 2048, %s41_s14, [#allocation7], %s1174_s23, %s1174_s23, %s1175_s24  }
  0x15   :  { %s1176_s27 = smov [#allocation3]   ;;  %s1177_s29 = smov [#allocation8]  }
  0x16   :  { %s27_s28 = sshll.u32 %s1176_s27, 4  ;;  %s52_s30 = sshll.u32 %s1177_s29, 4  ;;  %s28_s28 = int_to_ptr.vmem [resolvable:$true] %s27_s28  ;;  %s53_s30 = int_to_ptr.vmem [resolvable:$true] %s52_s30 }
  0x17   :  { %s1031_s13 = scalar_lea.hbm %s1379_s0, 16 }
  0x18   :  { %p1032_p8 = scmp.ne.s32.totalorder %s1379_s0, %s1031_s13  ;;  %p1035_p9 = scmp.lt.u32.totalorder %s1031_s13, %s1379_s0 }
  0x1a   :  { %p1037_p10 = pnand %p1035_p9, %p1032_p8 }
  0x1c   :  { %1040 = shalt.err (!%p1037_p10)
}
  0x1d   :  { %s1041_s3 = scalar_lea.vmem %s28_s28, 16  ;;  %s1045_s14 = scalar_lea.vmem %s28_s28, 32 }
  0x1e   :  { %p1042_p11 = scmp.ne.s32.totalorder %s28_s28, %s1041_s3  ;;  %p1046_p12 = scmp.lt.s32.totalorder %s28_s28, %s28_s28 }
  0x1f   :  { %p1047_p13 = scmp.lt.s32.totalorder %s1045_s14, %s1041_s3 }
  0x21   :  { %p1048_p0 = por %p1047_p13, %p1046_p12 }
  0x23   :  { %p1049_p1 = pnand %p1048_p0, %p1042_p11 }
  0x25   :  { %1052 = shalt.err (!%p1049_p1)
}
  0x26   :  { %30 = dma.hbm_to_vmem [thread:$0]  %s1379_s0, 16, %s28_s28, [#allocation4]  }
  0x27   :  { %s1053_s25 = scalar_lea.hbm %s1383_s4, 4096 }
  0x28   :  { %p1054_p2 = scmp.ne.s32.totalorder %s1383_s4, %s1053_s25  ;;  %p1057_p3 = scmp.lt.u32.totalorder %s1053_s25, %s1383_s4 }
  0x2a   :  { %p1059_p4 = pnand %p1057_p3, %p1054_p2 }
  0x2c   :  { %1062 = shalt.err (!%p1059_p4)
}
  0x2d   :  { %s1063_s12 = scalar_lea.vmem %s53_s30, 4096  ;;  %p1068_p6 = scmp.lt.s32.totalorder %s53_s30, %s53_s30 }
  0x2e   :  { %p1064_p5 = scmp.ne.s32.totalorder %s53_s30, %s1063_s12  ;;  %p1069_p7 = scmp.lt.s32.totalorder %s1063_s12, %s1063_s12 }
  0x30   :  { %p1070_p8 = por %p1069_p7, %p1068_p6 }
  0x32   :  { %p1071_p9 = pnand %p1070_p8, %p1064_p5 }
  0x34   :  { %1074 = shalt.err (!%p1071_p9)
}
  0x35   :  { %58 = dma.hbm_to_vmem [thread:$0]  %s1383_s4, 4096, %s53_s30, [#allocation7], %s1174_s23, %s1174_s23, %s1175_s24  }
  0x36   :  { %s1178_s13 = smov [#allocation9]   ;;  %s1075_s18 = scalar_lea.hbm %s1385_s6, 1024 }
  0x37   :  { %s66_s15 = sshll.u32 %s1178_s13, 4  ;;  %p1076_p10 = scmp.ne.s32.totalorder %s1385_s6, %s1075_s18  ;;  %s67_s15 = int_to_ptr.vmem [resolvable:$true] %s66_s15 }
  0x38   :  { %p1079_p11 = scmp.lt.u32.totalorder %s1075_s18, %s1385_s6 }
  0x3a   :  { %p1081_p12 = pnand %p1079_p11, %p1076_p10 }
  0x3c   :  { %1084 = shalt.err (!%p1081_p12)
}
  0x3d   :  { %s1085_s21 = scalar_lea.vmem %s67_s15, 1024  ;;  %p1090_p0 = scmp.lt.s32.totalorder %s67_s15, %s67_s15 }
  0x3e   :  { %p1086_p13 = scmp.ne.s32.totalorder %s67_s15, %s1085_s21  ;;  %p1091_p1 = scmp.lt.s32.totalorder %s1085_s21, %s1085_s21 }
  0x40   :  { %p1092_p2 = por %p1091_p1, %p1090_p0 }
  0x42   :  { %p1093_p3 = pnand %p1092_p2, %p1086_p13 }
  0x44   :  { %1096 = shalt.err (!%p1093_p3)
}
  0x45   :  { %s1179_s4 = smov 64   ;;  %s1180_s23 = smov 4  }
  0x46   :  { %72 = dma.hbm_to_vmem [thread:$0]  %s1385_s6, 1024, %s67_s15, [#allocation10], %s1179_s4, %s1179_s4, %s1180_s23  }
  0x47   :  { %1163 = dma.done.wait [#allocation4], 16  }
  0x48   :  { %1164 = vsyncadd [#allocation4], 4294967280 }
  0x49   :  { %1165 = dma.done.wait [#allocation7], 6144  }
  0x4a   :  { %1166 = vsyncadd [#allocation7], 4294961152 }
  0x4b   :  { %1167 = dma.done.wait [#allocation10], 1024  }
  0x4c   :  { %1168 = vsyncadd [#allocation10], 4294966272  ;;  %v1181_v0 = vmov 0   ;;  %v907_v1 = vld [vmem:[#allocation6 + $0x4] ss:$16 sps:$4 sm:$0xff]   ;;  %vm247_vm0 = vcmask 523264   ;;  %v227_v63 = vlaneseq }
  0x4d   :  { %283 = vmatprep.mubr.bf16.mxu1 %v1181_v0  ;;  %528 = vmatprep.mubr.bf16.mxu0 %v1181_v0  ;;  %v909_v2 = vld [vmem:[#allocation8 + $0x4] ss:$16 sps:$4 sm:$0xff]   ;;  %v911_v3 = vld [vmem:[#allocation6] ss:$16 sps:$4 sm:$0xff]   ;;  %v933_v17 = vld [vmem:[#allocation6 + $0xc] ss:$16 sps:$4 sm:$0xff]  }
  0x4e   :  { %251 = vmatprep.subr.bf16.mxu1 %v907_v1  ;;  %v912_v4 = vld [vmem:[#allocation8] ss:$16 sps:$4 sm:$0xff]   ;;  %496 = vmatprep.subr.bf16.mxu0 %v909_v2  ;;  %v913_v5 = vld [vmem:[#allocation6 + $0x24] ss:$16 sps:$4 sm:$0xff]   ;;  %v128_v19 = vld [vmem:[#allocation3] sm:$0x1] }
  0x4f   :  { %252 = vmatpush1.bf16.msra.mxu1 %v911_v3  ;;  %497 = vmatpush1.bf16.msra.mxu0 %v912_v4  ;;  %v915_v6 = vld [vmem:[#allocation8 + $0x24] ss:$16 sps:$4 sm:$0xff]   ;;  %v917_v7 = vld [vmem:[#allocation6 + $0x20] ss:$16 sps:$4 sm:$0xff]   ;;  %v931_v20 = vld [vmem:[#allocation6 + $0x8] ss:$16 sps:$4 sm:$0xff]  }
  0x50   :  { %253 = vmatprep.subr.bf16.mxu1 %v913_v5  ;;  %v918_v8 = vld [vmem:[#allocation8 + $0x20] ss:$16 sps:$4 sm:$0xff]   ;;  %498 = vmatprep.subr.bf16.mxu0 %v915_v6  ;;  %v919_v9 = vld [vmem:[#allocation6 + $0x44] ss:$16 sps:$4 sm:$0xff]   ;;  %v939_v22 = vld [vmem:[#allocation6 + $0x2c] ss:$16 sps:$4 sm:$0xff]  }
  0x51   :  { %v921_v10 = vld [vmem:[#allocation8 + $0x44] ss:$16 sps:$4 sm:$0xff]   ;;  %v923_v11 = vld [vmem:[#allocation6 + $0x40] ss:$16 sps:$4 sm:$0xff]   ;;  %v937_v24 = vld [vmem:[#allocation6 + $0x28] ss:$16 sps:$4 sm:$0xff]  }
  0x52   :  { %v924_v12 = vld [vmem:[#allocation8 + $0x40] ss:$16 sps:$4 sm:$0xff]   ;;  %v925_v13 = vld [vmem:[#allocation6 + $0x64] ss:$16 sps:$4 sm:$0xff]   ;;  %v945_v26 = vld [vmem:[#allocation6 + $0x4c] ss:$16 sps:$4 sm:$0xff]  }
  0x53   :  { %254 = vmatpush1.bf16.msra.mxu1 %v917_v7  ;;  %499 = vmatpush1.bf16.msra.mxu0 %v918_v8  ;;  %v927_v14 = vld [vmem:[#allocation8 + $0x64] ss:$16 sps:$4 sm:$0xff]   ;;  %v929_v15 = vld [vmem:[#allocation6 + $0x60] ss:$16 sps:$4 sm:$0xff]   ;;  %v943_v29 = vld [vmem:[#allocation6 + $0x48] ss:$16 sps:$4 sm:$0xff]  }
  0x54   :  { %255 = vmatprep.subr.bf16.mxu1 %v919_v9  ;;  %500 = vmatprep.subr.bf16.mxu0 %v921_v10  ;;  %v930_v16 = vld [vmem:[#allocation8 + $0x60] ss:$16 sps:$4 sm:$0xff]   ;;  %v934_v18 = vld [vmem:[#allocation8 + $0x84] ss:$16 sps:$4 sm:$0xff]   ;;  %v951_v31 = vld [vmem:[#allocation6 + $0x6c] ss:$16 sps:$4 sm:$0xff]  }
  0x55   :  { %v936_v21 = vld [vmem:[#allocation8 + $0x80] ss:$16 sps:$4 sm:$0xff]   ;;  %v940_v23 = vld [vmem:[#allocation8 + $0xa4] ss:$16 sps:$4 sm:$0xff]   ;;  %v949_v33 = vld [vmem:[#allocation6 + $0x68] ss:$16 sps:$4 sm:$0xff]  }
  0x56   :  { %v942_v25 = vld [vmem:[#allocation8 + $0xa0] ss:$16 sps:$4 sm:$0xff]   ;;  %v946_v27 = vld [vmem:[#allocation8 + $0xc4] ss:$16 sps:$4 sm:$0xff]   ;;  %v957_v36 = vld [vmem:[#allocation8 + $0xc] ss:$16 sps:$4 sm:$0xff]  }
  0x57   :  { %256 = vmatpush1.bf16.msra.mxu1 %v923_v11  ;;  %501 = vmatpush1.bf16.msra.mxu0 %v924_v12  ;;  %v92_v28 = vld [vmem:[%s1380_s1] sm:$0x1]  ;;  %v948_v30 = vld [vmem:[#allocation8 + $0xc0] ss:$16 sps:$4 sm:$0xff]   ;;  %v955_v38 = vld [vmem:[#allocation8 + $0x8] ss:$16 sps:$4 sm:$0xff]  }
  0x58   :  { %257 = vmatprep.subr.bf16.mxu1 %v925_v13  ;;  %502 = vmatprep.subr.bf16.mxu0 %v927_v14  ;;  %93 = vst [vmem:[#allocation12] sm:$0x1] %v92_v28  ;;  %v952_v32 = vld [vmem:[#allocation8 + $0xe4] ss:$16 sps:$4 sm:$0xff]   ;;  %v954_v34 = vld [vmem:[#allocation8 + $0xe0] ss:$16 sps:$4 sm:$0xff]  }
  0x59   :  { %v960_v39 = vld [vmem:[#allocation8 + $0x2c] ss:$16 sps:$4 sm:$0xff]   ;;  %v958_v40 = vld [vmem:[#allocation8 + $0x28] ss:$16 sps:$4 sm:$0xff]   ;;  %v94_v53 = vld [vmem:[%s1381_s2] sm:$0x1] }
  0x5a   :  { %v963_v41 = vld [vmem:[#allocation8 + $0x4c] ss:$16 sps:$4 sm:$0xff]   ;;  %v961_v42 = vld [vmem:[#allocation8 + $0x48] ss:$16 sps:$4 sm:$0xff]   ;;  %95 = vst [vmem:[#allocation14] sm:$0x1] %v94_v53 }
  0x5b   :  { %258 = vmatpush1.bf16.msra.mxu1 %v929_v15  ;;  %503 = vmatpush1.bf16.msra.mxu0 %v930_v16  ;;  %v966_v43 = vld [vmem:[#allocation8 + $0x6c] ss:$16 sps:$4 sm:$0xff]   ;;  %v964_v44 = vld [vmem:[#allocation8 + $0x68] ss:$16 sps:$4 sm:$0xff]   ;;  %v979_v54 = vld [vmem:[#allocation9] sm:$0xff]   ;;  %v1182_v55 = vmov 0.0  }
  0x5c   :  { %292 = vmatprep.subr.bf16.mxu1 %v933_v17  ;;  %504 = vmatprep.subr.bf16.mxu0 %v934_v18  ;;  %v969_v45 = vld [vmem:[#allocation8 + $0x8c] ss:$16 sps:$4 sm:$0xff]   ;;  %v967_v46 = vld [vmem:[#allocation8 + $0x88] ss:$16 sps:$4 sm:$0xff]   ;;  %v981_v57 = vld [vmem:[#allocation9 + $0x10] sm:$0xff]   ;;  %vm1183_vm1 = vmmov 0  }
  0x5d   :  { %v972_v47 = vld [vmem:[#allocation8 + $0xac] ss:$16 sps:$4 sm:$0xff]   ;;  %v970_v48 = vld [vmem:[#allocation8 + $0xa8] ss:$16 sps:$4 sm:$0xff]   ;;  %v983_v59 = vld [vmem:[#allocation9 + $0x20] sm:$0xff]   ;;  %v228_v3 = vshrl.u32 %v227_v63, 7 }
  0x5e   :  { %809 = vmatmul.mubr.msk.bf16.vlgmr.msra.gmra.mrb[0].mxu1 %vm247_vm0, %v128_v19  ;;  %v975_v49 = vld [vmem:[#allocation8 + $0xcc] ss:$16 sps:$4 sm:$0xff]   ;;  %v973_v50 = vld [vmem:[#allocation8 + $0xc8] ss:$16 sps:$4 sm:$0xff]   ;;  %v985_v61 = vld [vmem:[#allocation9 + $0x30] sm:$0xff]   ;;  %vm723_vm5 = vcmask 1040384  }
  0x5f   :  { %293 = vmatpush1.bf16.msra.mxu1 %v931_v20  ;;  %505 = vmatpush1.bf16.msra.mxu0 %v936_v21  ;;  %v333_v35 = vld [vmem:[#allocation12] sm:$0x1]  ;;  %v978_v51 = vld [vmem:[#allocation8 + $0xec] ss:$16 sps:$4 sm:$0xff]   ;;  %v976_v52 = vld [vmem:[#allocation8 + $0xe8] ss:$16 sps:$4 sm:$0xff]  }
  0x60   :  { %294 = vmatprep.subr.bf16.mxu1 %v939_v22  ;;  %506 = vmatprep.subr.bf16.mxu0 %v940_v23  ;;  %v335_v37 = vpack.c.bf16 %v333_v35, %v333_v35  ;;  %v980_v56 = vld [vmem:[#allocation9 + $0x8] sm:$0xff]   ;;  %v982_v58 = vld [vmem:[#allocation9 + $0x18] sm:$0xff]   ;;  %v229_v5 = vsub.s32 0, %v228_v3  ;;  %v233_v7 = vsub.s32 1, %v228_v3  ;;  %v237_v20 = vsub.s32 2, %v228_v3 }
  0x61   :  { %324 = vmatprep.mubr.bf16.mxu1 %v1181_v0  ;;  %v984_v60 = vld [vmem:[#allocation9 + $0x28] sm:$0xff]   ;;  %v986_v62 = vld [vmem:[#allocation9 + $0x38] sm:$0xff]   ;;  %v241_v22 = vsub.s32 3, %v228_v3 }
  0x62   :  { %v145_v6 = vld [vmem:[%s1384_s5] sm:$0xf] }
  0x63   :  { %295 = vmatpush1.bf16.msra.mxu1 %v937_v24  ;;  %507 = vmatpush1.bf16.msra.mxu0 %v942_v25  ;;  %v230_v8 = vrot.slane %v145_v6, %v229_v5  ;;  %v234_v9 = vrot.slane %v145_v6, %v233_v7  ;;  %v238_v25 = vrot.slane %v145_v6, %v237_v20 }
  0x64   :  { %296 = vmatprep.subr.bf16.mxu1 %v945_v26  ;;  %508 = vmatprep.subr.bf16.mxu0 %v946_v27  ;;  %v242_v27 = vrot.slane %v145_v6, %v241_v22 }
  0x67   :  { %297 = vmatpush1.bf16.msra.mxu1 %v943_v29  ;;  %509 = vmatpush1.bf16.msra.mxu0 %v948_v30 }
  0x68   :  { %298 = vmatprep.subr.bf16.mxu1 %v951_v31  ;;  %510 = vmatprep.subr.bf16.mxu0 %v952_v32 }
  0x6b   :  { %299 = vmatpush1.bf16.msra.mxu1 %v949_v33  ;;  %511 = vmatpush1.bf16.msra.mxu0 %v954_v34 }
  0x6c   :  { %537 = vmatprep.subr.bf16.mxu1 %v957_v36  ;;  %863 = vmatprep.subr.bf16.mxu0 %v1182_v55  ;;  %v334_v36 = vld [vmem:[#allocation14] sm:$0x1] }
  0x6e   :  { %529 = vmatmul.mubr.bf16.vlgmr.msra.gmra.mrb[0].mxu0 %v335_v37  ;;  %810 = vmatmul.mubr.msk.bf16.vlgmr.msra.gmra.mrb[4].mxu1 %vm247_vm0, %v128_v19 }
  0x6f   :  { %538 = vmatpush1.bf16.msra.mxu1 %v955_v38  ;;  %569 = vmatprep.mubr.bf16.mxu1 %v1181_v0 }
  0x70   :  { %539 = vmatprep.subr.bf16.mxu1 %v960_v39  ;;  %864 = vmatpush3.bf16.msra.mxu0 %v979_v54 }
  0x71   :  { %865 = vmatprep.subr.bf16.mxu0 %v1182_v55  ;;  %879 = vmatprep.mubr.msk.bf16.mxu0 %vm1183_vm1, %v1182_v55 }
  0x73   :  { %540 = vmatpush1.bf16.msra.mxu1 %v958_v40 }
  0x74   :  { %541 = vmatprep.subr.bf16.mxu1 %v963_v41  ;;  %866 = vmatpush3.bf16.msra.mxu0 %v980_v56 }
  0x75   :  { %867 = vmatprep.subr.bf16.mxu0 %v1182_v55 }
  0x77   :  { %542 = vmatpush1.bf16.msra.mxu1 %v961_v42 }
  0x78   :  { %543 = vmatprep.subr.bf16.mxu1 %v966_v43  ;;  %868 = vmatpush3.bf16.msra.mxu0 %v981_v57 }
  0x79   :  { %869 = vmatprep.subr.bf16.mxu0 %v1182_v55 }
  0x7b   :  { %544 = vmatpush1.bf16.msra.mxu1 %v964_v44 }
  0x7c   :  { %545 = vmatprep.subr.bf16.mxu1 %v969_v45  ;;  %870 = vmatpush3.bf16.msra.mxu0 %v982_v58 }
  0x7d   :  { %871 = vmatprep.subr.bf16.mxu0 %v1182_v55 }
  0x7f   :  { %546 = vmatpush1.bf16.msra.mxu1 %v967_v46 }
  0x80   :  { %547 = vmatprep.subr.bf16.mxu1 %v972_v47  ;;  %872 = vmatpush3.bf16.msra.mxu0 %v983_v59 }
  0x81   :  { %873 = vmatprep.subr.bf16.mxu0 %v1182_v55 }
  0x83   :  { %548 = vmatpush1.bf16.msra.mxu1 %v970_v48 }
  0x84   :  { %549 = vmatprep.subr.bf16.mxu1 %v975_v49  ;;  %874 = vmatpush3.bf16.msra.mxu0 %v984_v60  ;;  %v1311_v49 = vand.u32 127, %v227_v63 }
  0x85   :  { %875 = vmatprep.subr.bf16.mxu0 %v1182_v55 }
  0x86   :  { %vm719_vm2 = vcmp.ge.s32.totalorder %v1311_v49, 5  ;;  %vm720_vm3 = vcmp.lt.s32.totalorder %v1311_v49, 10  ;;  %vm718_vm4 = vcmp.lt.s32.totalorder %v1311_v49, 5 }
  0x87   :  { %550 = vmatpush1.bf16.msra.mxu1 %v973_v50  ;;  %v627_v50 = vld [vmem:[%s1386_s7] sm:$0x1]  ;;  %vm1321_vm6 = vmand %vm719_vm2, %vm720_vm3  ;;  %s1184_s7 = smov [#allocation12]  }
  0x88   :  { %551 = vmatprep.subr.bf16.mxu1 %v978_v51  ;;  %876 = vmatpush3.bf16.msra.mxu0 %v985_v61  ;;  %s765_s29 = sshll.u32 %s1184_s7, 4  ;;  %s766_s29 = int_to_ptr.vmem [resolvable:$true] %s765_s29 }
  0x89   :  { %877 = vmatprep.subr.bf16.mxu0 %v1182_v55  ;;  %s1097_s11 = scalar_lea.vmem %s766_s29, 16  ;;  %s1101_s12 = scalar_lea.vmem %s766_s29, 32 }
  0x8a   :  { %p1098_p4 = scmp.ne.s32.totalorder %s766_s29, %s1097_s11  ;;  %p1102_p5 = scmp.lt.s32.totalorder %s766_s29, %s766_s29 }
  0x8b   :  { %552 = vmatpush1.bf16.msra.mxu1 %v976_v52  ;;  %p1103_p6 = scmp.lt.s32.totalorder %s1101_s12, %s1097_s11 }
  0x8c   :  { %878 = vmatpush3.bf16.msra.mxu0 %v986_v62 }
  0x8d   :  { %p1104_p7 = por %p1103_p6, %p1102_p5 }
  0x8e   :  { %570 = vmatmul.mubr.bf16.vlgmr.msra.gmra.mrb[4].mxu1 %v335_v37 }
  0x8f   :  { %p1105_p8 = pnand %p1104_p7, %p1098_p4 }
 0x131   :  { %v285_v0 = vpop.f32.mrb[0].mxu1 }
 0x132   :  { %v287_v1 = vpop.f32.mrb[1].mxu1  ;;  %v286_v10 = vadd.f32 %v285_v0, %v230_v8 }
 0x133   :  { %v289_v2 = vpop.f32.mrb[2].mxu1  ;;  %v288_v11 = vadd.f32 %v287_v1, %v234_v9 }
 0x134   :  { %v290_v4 = vpop.f32.mrb[3].mxu1 }
 0x141   :  { %v530_v12 = vpop.f32.mrb[0].mxu0 }
 0x142   :  { %v578_v13 = vadd.f32 %v530_v12, %v286_v10  ;;  %v532_v14 = vpop.f32.mrb[1].mxu0 }
 0x143   :  { %v579_v15 = vadd.f32 %v532_v14, %v288_v11  ;;  %v534_v16 = vpop.f32.mrb[2].mxu0 }
 0x144   :  { %v535_v17 = vpop.f32.mrb[3].mxu0  ;;  %v843_v19 = vmul.f32 -1.442695, %v578_v13 }
 0x145   :  { %v844_v18 = vmul.f32 -1.442695, %v579_v15 }
 0x147   :  { %987 = vpow2.f32 %v844_v18 }
 0x148   :  { %989 = vpow2.f32 %v843_v19 }
 0x151   :  { %v988_v21 = vpop.eup %987 }
 0x152   :  { %v990_v23 = vpop.eup %989  ;;  %v591_v24 = vadd.f32 1.0, %v988_v21 }
 0x153   :  { %v585_v26 = vadd.f32 1.0, %v990_v23 }
 0x154   :  { %991 = vrcp.f32 %v591_v24 }
 0x155   :  { %993 = vrcp.f32 %v585_v26 }
 0x15e   :  { %v992_v35 = vpop.eup %991 }
 0x15f   :  { %v994_v37 = vpop.eup %993  ;;  %v601_v39 = vmul.f32 %v992_v35, %v334_v36 }
 0x161   :  { %v571_v28 = vpop.f32.mrb[4].mxu1 }
 0x162   :  { %v887_v29 = vadd.f32 %v571_v28, %v238_v25  ;;  %v573_v30 = vpop.f32.mrb[5].mxu1 }
 0x163   :  { %v888_v31 = vadd.f32 %v573_v30, %v242_v27  ;;  %v575_v32 = vpop.f32.mrb[6].mxu1 }
 0x164   :  { %995 = vtanh.f32 %v887_v29  ;;  %v576_v33 = vpop.f32.mrb[7].mxu1 }
 0x165   :  { %v845_v34 = vmul.f32 -1.442695, %v888_v31 }
 0x167   :  { %997 = vpow2.f32 %v845_v34 }
 0x16e   :  { %v996_v38 = vpop.eup %995 }
 0x16f   :  { %v602_v40 = vmul.f32 %v996_v38, %v994_v37 }
 0x171   :  { %v998_v41 = vpop.eup %997  ;;  %v603_v42 = vadd.f32 %v602_v40, %v601_v39 }
 0x172   :  { %v598_v43 = vadd.f32 1.0, %v998_v41 }
 0x173   :  { %999 = vtanh.f32 %v603_v42  ;;  %608 = vst [vmem:[#allocation14] sm:$0x1] %v603_v42 }
 0x174   :  { %1001 = vrcp.f32 %v598_v43 }
 0x17d   :  { %v1000_v44 = vpop.eup %999 }
 0x17e   :  { %v1002_v45 = vpop.eup %1001 }
 0x17f   :  { %v605_v46 = vmul.f32 %v1002_v45, %v1000_v44 }
 0x181   :  { %606 = vst [vmem:[#allocation2] sm:$0x1] %v605_v46  ;;  %607 = vst [vmem:[#allocation12] sm:$0x1] %v605_v46 }
 0x188   :  { %v609_v47 = vld [vmem:[#allocation2] sm:$0x1] }
 0x189   :  { %v610_v48 = vpack.c.bf16 %v609_v47, %v609_v47 }
 0x18b   :  { %880 = vmatmul.mubr.bf16.vlgmr.msra.gmra.mrb[4].mxu0 %v610_v48 }
 0x25e   :  { %v710_v51 = vpop.f32.mrb[4].mxu0 }
 0x25f   :  { %v711_v52 = vadd.f32 %v710_v51, %v627_v50  ;;  %v881_v53 = vpop.f32.mrb[5].mxu0 }
 0x260   :  { %v713_v54 = vpop.f32.mrb[6].mxu0 }
 0x261   :  { %v882_v56 = vpop.f32.mrb[7].mxu0  ;;  %v722_v57 = vsel %vm718_vm4, %v711_v52, -1e+30  ;;  %v727_v59 = vsel %vm1321_vm6, %v711_v52, -1e+30 }
 0x262   :  { %v724_v58 = vsel %vm723_vm5, %v722_v57, -inf  ;;  %v728_v60 = vsel %vm723_vm5, %v727_v59, -inf }
 0x263   :  { %725 = vmax.xlane.f32.xlu0 %v724_v58 }
 0x267   :  { %729 = vmax.xlane.f32.xlu0 %v728_v60 }
 0x2f0   :  { %v726_v61 = vpop.xlane.xlu0 %725 }
 0x2f4   :  { %v730_v62 = vpop.xlane.xlu0 %729 }
 0x2f5   :  { %v731_v63 = vsel %vm718_vm4, %v726_v61, %v730_v62 }
 0x2f6   :  { %v732_v0 = vsub.f32 %v711_v52, %v731_v63 }
 0x2f8   :  { %v733_v1 = vsel %vm720_vm3, %v732_v0, -1e+30 }
 0x2f9   :  { %v734_v2 = vmul.f32 1.442695, %v733_v1 }
 0x2fb   :  { %1003 = vpow2.f32 %v734_v2 }
 0x305   :  { %v1004_v3 = vpop.eup %1003 }
 0x306   :  { %v736_v4 = vsel %vm718_vm4, %v1004_v3, 0.0  ;;  %v740_v6 = vsel %vm1321_vm6, %v1004_v3, 0.0 }
 0x307   :  { %v737_v5 = vsel %vm723_vm5, %v736_v4, 0.0  ;;  %v741_v7 = vsel %vm723_vm5, %v740_v6, 0.0 }
 0x308   :  { %738 = vadd.xlane.f32.xlu1 %v737_v5 }
 0x30c   :  { %742 = vadd.xlane.f32.xlu1 %v741_v7 }
 0x30d   :  { %1108 = shalt.err (!%p1105_p8)
}
 0x30e   :  { %s1109_s13 = scalar_lea.hbm %s1388_s9, 16 }
 0x30f   :  { %p1110_p9 = scmp.ne.s32.totalorder %s1388_s9, %s1109_s13  ;;  %p1113_p10 = scmp.lt.u32.totalorder %s1109_s13, %s1388_s9 }
 0x311   :  { %p1115_p11 = pnand %p1113_p10, %p1110_p9 }
 0x313   :  { %1118 = shalt.err (!%p1115_p11)
}
 0x314   :  { %768 = dma.vmem_to_hbm [thread:$0]  %s766_s29, 16, %s1388_s9, [#allocation13]  }
 0x315   :  { %s1185_s19 = smov [#allocation14]  }
 0x316   :  { %s775_s20 = sshll.u32 %s1185_s19, 4  ;;  %s776_s20 = int_to_ptr.vmem [resolvable:$true] %s775_s20 }
 0x317   :  { %s1119_s21 = scalar_lea.vmem %s776_s20, 16  ;;  %s1123_s4 = scalar_lea.vmem %s776_s20, 32 }
 0x318   :  { %p1120_p12 = scmp.ne.s32.totalorder %s776_s20, %s1119_s21  ;;  %p1124_p13 = scmp.lt.s32.totalorder %s776_s20, %s776_s20 }
 0x319   :  { %p1125_p0 = scmp.lt.s32.totalorder %s1123_s4, %s1119_s21 }
 0x31b   :  { %p1126_p1 = por %p1125_p0, %p1124_p13 }
 0x31d   :  { %p1127_p2 = pnand %p1126_p1, %p1120_p12 }
 0x31f   :  { %1130 = shalt.err (!%p1127_p2)
}
 0x320   :  { %s1131_s30 = scalar_lea.hbm %s1389_s10, 16 }
 0x321   :  { %p1132_p3 = scmp.ne.s32.totalorder %s1389_s10, %s1131_s30  ;;  %p1135_p4 = scmp.lt.u32.totalorder %s1131_s30, %s1389_s10 }
 0x323   :  { %p1137_p5 = pnand %p1135_p4, %p1132_p3 }
 0x325   :  { %1140 = shalt.err (!%p1137_p5)
}
 0x326   :  { %778 = dma.vmem_to_hbm [thread:$0]  %s776_s20, 16, %s1389_s10, [#allocation13]  }
 0x327   :  { %s1186_s26 = smov [#allocation11]  }
 0x328   :  { %s755_s5 = sshll.u32 %s1186_s26, 4  ;;  %s756_s5 = int_to_ptr.vmem [resolvable:$true] %s755_s5 }
 0x329   :  { %s1141_s27 = scalar_lea.vmem %s756_s5, 16  ;;  %s1145_s7 = scalar_lea.vmem %s756_s5, 32 }
 0x32a   :  { %p1142_p6 = scmp.ne.s32.totalorder %s756_s5, %s1141_s27  ;;  %p1146_p7 = scmp.lt.s32.totalorder %s756_s5, %s756_s5 }
 0x32b   :  { %p1147_p8 = scmp.lt.s32.totalorder %s1145_s7, %s1141_s27 }
 0x32d   :  { %p1148_p9 = por %p1147_p8, %p1146_p7 }
 0x32f   :  { %p1149_p10 = pnand %p1148_p9, %p1142_p6 }
 0x395   :  { %v739_v8 = vpop.xlane.xlu1 %738 }
 0x396   :  { %1005 = vrcp.f32 %v739_v8 }
 0x399   :  { %v743_v9 = vpop.xlane.xlu1 %742 }
 0x39a   :  { %1007 = vrcp.f32 %v743_v9 }
 0x3a0   :  { %v1006_v10 = vpop.eup %1005 }
 0x3a4   :  { %v1008_v11 = vpop.eup %1007 }
 0x3a5   :  { %v746_v12 = vsel %vm718_vm4, %v1006_v10, %v1008_v11 }
 0x3a6   :  { %v747_v13 = vmul.f32 %v1004_v3, %v746_v12 }
 0x3a8   :  { %748 = vst [vmem:[#allocation11] sm:$0x1] %v747_v13 }
 0x3a9   :  { %1152 = shalt.err (!%p1149_p10)
}
 0x3aa   :  { %s1153_s11 = scalar_lea.hbm %s1387_s8, 16 }
 0x3ab   :  { %p1154_p11 = scmp.ne.s32.totalorder %s1387_s8, %s1153_s11  ;;  %p1157_p12 = scmp.lt.u32.totalorder %s1153_s11, %s1387_s8 }
 0x3ad   :  { %p1159_p13 = pnand %p1157_p12, %p1154_p11 }
 0x3af   :  { %1162 = shalt.err (!%p1159_p13)
}
 0x3b0   :  { %758 = dma.vmem_to_hbm [thread:$0]  %s756_s5, 16, %s1387_s8, [#allocation5]  }
 0x3b1   :  { %1169 = dma.done.wait [#allocation5], 16  }
 0x3b2   :  { %1170 = vsyncadd [#allocation5], 4294967280 }
 0x3b3   :  { %1171 = dma.done.wait [#allocation13], 32  }
 0x3b4   :  { %1172 = vsyncadd [#allocation13], 4294967264 }
 0x3b5   :  { %788 = vsyncpa [#allocation4], 1 }
 0x3b6   :  { %789 = vsyncpa [#allocation7], 1 }
 0x3b7   :  { %790 = vsyncpa [#allocation10], 1 }
 0x3b8   :  { %791 = vsyncpa [#allocation5], 1 }
 0x3b9   :  { %792 = vsyncpa [#allocation13], 1 }

</bundles_post_ra>
